<compile_context>
chip_gen: v6e
topology: v6e:2x2x1
jax: 0.10.0
libtpu: 0.0.40
codegen_flags: <defaults>
</compile_context>

<pallas_src>
import functools

import numpy as np
import jax
import jax.numpy as jnp
from jax import lax
from jax.experimental import pallas as pl
from jax.experimental.pallas import tpu as pltpu


def _round_up(x, m):
    return ((x + m - 1) // m) * m


# ----------------------------- Pallas kernel ------------------------------ #

def _gelu_exact(x):
    # torch.nn.GELU() default = exact erf formulation.
    return 0.5 * x * (1.0 + lax.erf(x * jnp.float32(0.7071067811865476)))


def _layernorm_onepass(x, gamma, beta, inv_n, eps=1e-5):
    # One pass over the (lane-padded) row.  Padded lanes are exactly 0, so dividing
    # the sums by the TRUE feature count gives the correct mean / biased variance.
    s1 = jnp.sum(x, axis=-1, keepdims=True)
    s2 = jnp.sum(x * x, axis=-1, keepdims=True)
    mu = s1 * inv_n
    var = jnp.maximum(s2 * inv_n - mu * mu, 0.0)    # clamp f32 cancellation
    return (x - mu) * lax.rsqrt(var + eps) * gamma + beta


def _decoder_kernel(z_ref, w1_ref, w2_ref, w5_ref, vec_ref, out_ref, *,
                    hidden, hidden_pad, out_pad):
    inv_n = jnp.float32(1.0 / hidden)

    # Packed per-layer vector slab (static row slices; single resident DMA).
    b1 = vec_ref[0:1, 0:hidden_pad]
    g1 = vec_ref[1:2, 0:hidden_pad]
    be1 = vec_ref[2:3, 0:hidden_pad]
    b2 = vec_ref[3:4, 0:hidden_pad]
    g2 = vec_ref[4:5, 0:hidden_pad]
    be2 = vec_ref[5:6, 0:hidden_pad]
    b5 = vec_ref[6:7, 0:out_pad]
    exp_m = vec_ref[7:8, 0:out_pad] > 0.5   # Gaussian-sigma columns
    sig_m = vec_ref[8:9, 0:out_pad] > 0.5   # Bernoulli columns

    def mm(a, w_ref):
        # Weights arrive already in their compute dtype (bf16 or f32); only the
        # activation tile is cast.  Accumulation is always f32.
        w = w_ref[...]
        return jnp.dot(a.astype(w.dtype), w, preferred_element_type=jnp.float32)

    z = z_ref[...]

    # body1 / body2: Linear -> LayerNorm -> GELU
    h1 = _gelu_exact(_layernorm_onepass(mm(z, w1_ref) + b1, g1, be1, inv_n))
    h2 = _gelu_exact(_layernorm_onepass(mm(h1, w2_ref) + b2, g2, be2, inv_n))

    # body5: Linear only (bNorm[4] == 0, relu[4] == 0, drop[4] == 0)
    raw = mm(h2, w5_ref) + b5

    # Fused epilogue: a single exp pass serves both exp(sigma) and sigmoid(binary)
    # (sigmoid = 1 / (1 + exp(-x)); reciprocal rides the otherwise-idle EUP slot).
    e = jnp.exp(jnp.where(sig_m, -raw, raw))
    sig = pl.reciprocal(1.0 + e, approx=True)
    out = jnp.where(exp_m, e, raw)
    out = jnp.where(sig_m, sig, out)
    out_ref[...] = out


# ------------------------------ JAX wrapper ------------------------------- #

def decoder_forward(z, params, feature_type_dict, *, use_bf16_matmul=True):
    B, zdim = z.shape
    hidden = params["w1"].shape[1]

    # --- output-column permutation: mu | sigma | binary | categorical ---------
    real_cols = [c for (s, e) in feature_type_dict["real_param"] for c in range(s, e)]
    n_real = len(feature_type_dict["real_data"])
    assert len(real_cols) == 2 * n_real, "real_param must hold mu then sigma blocks"
    bin_cols = [v[0] for v in feature_type_dict["binary_param"]]
    cat_cols = [c for (s, e) in feature_type_dict["categorical_param"] for c in range(s, e)]
    n_bin, n_cat = len(bin_cols), len(cat_cols)
    perm = np.asarray(real_cols + bin_cols + cat_cols, dtype=np.int32)
    n_perm = int(perm.shape[0])

    # --- lane-dense padding ----------------------------------------------------
    hidden_pad = _round_up(hidden, 128)
    out_pad = _round_up(max(n_perm, 1), 128)
    slab_w = max(hidden_pad, out_pad)

    f32 = jnp.float32
    wdt = jnp.bfloat16 if use_bf16_matmul else jnp.float32

    # Pad weights so padded lanes are exactly zero (LN gamma/beta pad = 0 keeps the
    # padded activations at 0 through GELU, so padded W2/W5 rows contribute nothing).
    w1 = jnp.pad(params["w1"].astype(f32),
                 ((0, 0), (0, hidden_pad - hidden))).astype(wdt)
    w2 = jnp.pad(params["w2"].astype(f32),
                 ((0, hidden_pad - hidden), (0, hidden_pad - hidden))).astype(wdt)
    w5_perm = jnp.take(params["w5"].astype(f32), jnp.asarray(perm), axis=1)
    w5 = jnp.pad(w5_perm,
                 ((0, hidden_pad - hidden), (0, out_pad - n_perm))).astype(wdt)
    b5_perm = jnp.take(jnp.reshape(params["b5"], (-1,)).astype(f32), jnp.asarray(perm))

    # Disjoint epilogue masks on the permuted (contiguous) layout.
    exp_mask = np.zeros((slab_w,), np.float32)
    exp_mask[n_real:2 * n_real] = 1.0
    sig_mask = np.zeros((slab_w,), np.float32)
    sig_mask[2 * n_real:2 * n_real + n_bin] = 1.0
    assert not np.any((exp_mask > 0) & (sig_mask > 0))

    def _row(v):
        v = jnp.reshape(jnp.asarray(v, f32), (-1,))
        return jnp.pad(v, (0, slab_w - v.shape[0]))

    # Pack the 9 small vectors into a single (9, slab_w) slab -> one resident DMA.
    vec = jnp.stack([
        _row(params["b1"]), _row(params["g1"]), _row(params["be1"]),
        _row(params["b2"]), _row(params["g2"]), _row(params["be2"]),
        _row(b5_perm), jnp.asarray(exp_mask), jnp.asarray(sig_mask),
    ], axis=0)

    # --- batch tiling ------------------------------------------------------------
    z_in = z.astype(f32)
    if B >= 16:
        # >= 2 grid steps so the "parallel" axis can split across v7x's 2 TensorCores;
        # partial edge blocks are fine (row-wise math, masked writeback).
        TB = min(512, _round_up(pl.cdiv(B, 2), 8))
        B_rows = B
    else:
        TB = _round_up(max(B, 1), 8)
        B_rows = TB
        if B_rows != B:
            z_in = jnp.pad(z_in, ((0, B_rows - B), (0, 0)))
    grid = (pl.cdiv(B_rows, TB),)

    # --- VMEM budget (weights double-buffered by default; fine at these sizes) ----
    wi = jnp.dtype(wdt).itemsize
    est = 2 * (zdim * hidden_pad * wi + hidden_pad * hidden_pad * wi
               + hidden_pad * out_pad * wi + 9 * slab_w * 4
               + TB * zdim * 4 + TB * out_pad * 4) + (2 << 20)
    vmem_limit = int(min(max(est, 16 << 20), 64 << 20))
    # NOTE: for hidden >~ 2-3K (esp. v7x 64 MiB VMEM) add a K/N reduction grid axis
    # with an f32 accumulator instead of keeping the full weights resident.

    kernel = functools.partial(_decoder_kernel, hidden=hidden,
                               hidden_pad=hidden_pad, out_pad=out_pad)

    out = pl.pallas_call(
        kernel,
        grid=grid,
        in_specs=[
            pl.BlockSpec((TB, zdim), lambda i: (i, 0)),            # activations: batch-tiled
            pl.BlockSpec((zdim, hidden_pad), lambda i: (0, 0)),    # weights: VMEM-resident
            pl.BlockSpec((hidden_pad, hidden_pad), lambda i: (0, 0)),
            pl.BlockSpec((hidden_pad, out_pad), lambda i: (0, 0)),
            pl.BlockSpec((9, slab_w), lambda i: (0, 0)),           # packed vectors/masks
        ],
        out_specs=pl.BlockSpec((TB, out_pad), lambda i: (i, 0)),   # lane-dense output
        out_shape=jax.ShapeDtypeStruct((B_rows, out_pad), jnp.float32),
        compiler_params=pltpu.CompilerParams(
            dimension_semantics=("parallel",),
            vmem_limit_bytes=vmem_limit),
    )(z_in, w1, w2, w5, vec)

    # Permuted layout -> the epilogue is plain static slices (no gathers/concats).
    xhat_gauss_mu = out[:B, 0:n_real]
    xhat_gauss_std = out[:B, n_real:2 * n_real]                       # exp() in-kernel
    xhat_bernoulli = out[:B, 2 * n_real:2 * n_real + n_bin]           # sigmoid() in-kernel
    xhat_categorical = out[:B, 2 * n_real + n_bin:2 * n_real + n_bin + n_cat]
    return xhat_gauss_mu, xhat_gauss_std, xhat_bernoulli, xhat_categorical


# --------------------------- pure-JAX reference ---------------------------- #

def _decoder_reference(z, params, feature_type_dict):
    def ln(x, g, b, eps=1e-5):
        mu = jnp.mean(x, axis=-1, keepdims=True)
        var = jnp.mean((x - mu) ** 2, axis=-1, keepdims=True)
        return (x - mu) * lax.rsqrt(var + eps) * jnp.reshape(g, (1, -1)) + jnp.reshape(b, (1, -1))

    def gelu(x):
        return 0.5 * x * (1.0 + lax.erf(x * jnp.float32(0.7071067811865476)))

    h1 = gelu(ln(z @ params["w1"] + jnp.reshape(params["b1"], (1, -1)),
                 params["g1"], params["be1"]))
    h2 = gelu(ln(h1 @ params["w2"] + jnp.reshape(params["b2"], (1, -1)),
                 params["g2"], params["be2"]))
    xhat = h2 @ params["w5"] + jnp.reshape(params["b5"], (1, -1))

    gauss = jnp.concatenate(
        [xhat[:, s:e] for (s, e) in feature_type_dict["real_param"]], axis=1)
    n_real = len(feature_type_dict["real_data"])
    mu = gauss[:, :n_real]
    std = jnp.exp(gauss[:, n_real:2 * n_real])
    bern = jnp.concatenate(
        [jax.nn.sigmoid(xhat[:, v[0]:v[0] + 1]) for v in feature_type_dict["binary_param"]], axis=1)
    cat = jnp.concatenate(
        [xhat[:, s:e] for (s, e) in feature_type_dict["categorical_param"]], axis=1)
    return mu, std, bern, cat


# ------------------------ deterministic param init ------------------------ #

def init_params(key, zdim, hidden, out_dim):
    ks = jax.random.split(key, 6)
    scale = 0.1
    return {
        # Linear weights stored pre-transposed as (in, out): y = x @ W + b
        "w1": scale * jax.random.normal(ks[0], (zdim, hidden), jnp.float32),
        "b1": scale * jax.random.normal(ks[1], (hidden,), jnp.float32),
        "g1": jnp.ones((hidden,), jnp.float32),     # LayerNorm weight (torch default)
        "be1": jnp.zeros((hidden,), jnp.float32),   # LayerNorm bias   (torch default)
        "w2": scale * jax.random.normal(ks[2], (hidden, hidden), jnp.float32),
        "b2": scale * jax.random.normal(ks[3], (hidden,), jnp.float32),
        "g2": jnp.ones((hidden,), jnp.float32),
        "be2": jnp.zeros((hidden,), jnp.float32),
        "w5": scale * jax.random.normal(ks[4], (hidden, out_dim), jnp.float32),
        "b5": scale * jax.random.normal(ks[5], (out_dim,), jnp.float32),
    }
    # TODO(synk): body3 / body4 params exist in __init__ but are unused in forward().


# --------------------------------- main ------------------------------------ #

if __name__ == "__main__":
    # Small config consistent with the module:
    #   zdim=32, arch = [[64], [64,64], ..., [64, output_dim]]
    #   bNorm = [64,64,...,0], relu = [1,1,...,0], drop = [0,...,0]
    zdim, hidden, batch = 32, 64, 2
    # output layout: 4 real mu | 4 real sigma | 2 binary | 3+3 categorical = 16
    output_dim = 16
    feature_type_dict = {
        "real_param": [(0, 4), (4, 8)],            # mu block then sigma block
        "real_data": [0, 1, 2, 3],                 # 4 real-valued features
        "binary_param": [(8, 9), (9, 10)],         # 2 binary features
        "categorical_param": [(10, 13), (13, 16)]  # two 3-way categoricals
    }

    key = jax.random.PRNGKey(0)
    kz, kp = jax.random.split(key)
    z = jax.random.normal(kz, (batch, zdim), jnp.float32)
    params = init_params(kp, zdim, hidden, output_dim)

    # Default (performance) path: bf16 MXU operands, f32 accumulation / epilogue.
    mu, std, bern, cat = decoder_forward(z, params, feature_type_dict,
                                         use_bf16_matmul=True)
    jax.block_until_ready((mu, std, bern, cat))

    # Shape checks
    assert mu.shape == (batch, 4)
    assert std.shape == (batch, 4)
    assert bern.shape == (batch, 2)
    assert cat.shape == (batch, 6)

    # Numerical checks against a pure-JAX f32 reference of the torch forward.
    rmu, rstd, rbern, rcat = _decoder_reference(z, params, feature_type_dict)
    for a, b in ((mu, rmu), (std, rstd), (bern, rbern), (cat, rcat)):
        assert np.allclose(np.asarray(a), np.asarray(b), rtol=3e-2, atol=3e-2)

    # Strict-parity path (f32 matmuls) against the same reference.
    fmu, fstd, fbern, fcat = decoder_forward(z, params, feature_type_dict,
                                             use_bf16_matmul=False)
    jax.block_until_ready((fmu, fstd, fbern, fcat))
    for a, b in ((fmu, rmu), (fstd, rstd), (fbern, rbern), (fcat, rcat)):
        assert np.allclose(np.asarray(a), np.asarray(b), rtol=2e-3, atol=2e-3)

    print("KERNEL_OK")
</pallas_src>

<mosaic_0001>
module attributes {stable_mosaic.version = 11 : i64} {
  func.func @_decoder_kernel(%arg0: i32, %arg1: memref<8x32xf32, #tpu.memory_space<vmem>>, %arg2: memref<32x128xbf16, #tpu.memory_space<vmem>>, %arg3: memref<128x128xbf16, #tpu.memory_space<vmem>>, %arg4: memref<128x128xbf16, #tpu.memory_space<vmem>>, %arg5: memref<9x128xf32, #tpu.memory_space<vmem>>, %arg6: memref<8x128xf32, #tpu.memory_space<vmem>>) attributes {dimension_semantics = [#tpu.dimension_semantics<parallel>], iteration_bounds = array<i64: 1>, scalar_prefetch = 0 : i64, scratch_operands = 0 : i64, tpu.core_type = #tpu.core_type<tc>, window_params = [{transform_indices = @transform_0, window_bounds = array<i64: 8, 32>}, {pipeline_mode = #tpu.pipeline_mode<synchronous>, transform_indices = @transform_1, window_bounds = array<i64: 32, 128>}, {pipeline_mode = #tpu.pipeline_mode<synchronous>, transform_indices = @transform_2, window_bounds = array<i64: 128, 128>}, {pipeline_mode = #tpu.pipeline_mode<synchronous>, transform_indices = @transform_3, window_bounds = array<i64: 128, 128>}, {pipeline_mode = #tpu.pipeline_mode<synchronous>, transform_indices = @transform_4, window_bounds = array<i64: 9, 128>}, {transform_indices = @transform_5, window_bounds = array<i64: 8, 128>}]} {
    %c0 = arith.constant 0 : index
    %c0_0 = arith.constant 0 : index
    %0 = vector.load %arg5[%c0, %c0_0] : memref<9x128xf32, #tpu.memory_space<vmem>>, vector<1x128xf32>
    %c1 = arith.constant 1 : index
    %c0_1 = arith.constant 0 : index
    %1 = vector.load %arg5[%c1, %c0_1] : memref<9x128xf32, #tpu.memory_space<vmem>>, vector<1x128xf32>
    %c2 = arith.constant 2 : index
    %c0_2 = arith.constant 0 : index
    %2 = vector.load %arg5[%c2, %c0_2] : memref<9x128xf32, #tpu.memory_space<vmem>>, vector<1x128xf32>
    %c3 = arith.constant 3 : index
    %c0_3 = arith.constant 0 : index
    %3 = vector.load %arg5[%c3, %c0_3] : memref<9x128xf32, #tpu.memory_space<vmem>>, vector<1x128xf32>
    %c4 = arith.constant 4 : index
    %c0_4 = arith.constant 0 : index
    %4 = vector.load %arg5[%c4, %c0_4] : memref<9x128xf32, #tpu.memory_space<vmem>>, vector<1x128xf32>
    %c5 = arith.constant 5 : index
    %c0_5 = arith.constant 0 : index
    %5 = vector.load %arg5[%c5, %c0_5] : memref<9x128xf32, #tpu.memory_space<vmem>>, vector<1x128xf32>
    %c6 = arith.constant 6 : index
    %c0_6 = arith.constant 0 : index
    %6 = vector.load %arg5[%c6, %c0_6] : memref<9x128xf32, #tpu.memory_space<vmem>>, vector<1x128xf32>
    %c7 = arith.constant 7 : index
    %c0_7 = arith.constant 0 : index
    %7 = vector.load %arg5[%c7, %c0_7] : memref<9x128xf32, #tpu.memory_space<vmem>>, vector<1x128xf32>
    %cst = arith.constant 5.000000e-01 : f32
    %8 = vector.broadcast %cst : f32 to vector<1x128xf32>
    %9 = arith.cmpf ogt, %7, %8 : vector<1x128xf32>
    %c8 = arith.constant 8 : index
    %c0_8 = arith.constant 0 : index
    %10 = vector.load %arg5[%c8, %c0_8] : memref<9x128xf32, #tpu.memory_space<vmem>>, vector<1x128xf32>
    %cst_9 = arith.constant 5.000000e-01 : f32
    %11 = vector.broadcast %cst_9 : f32 to vector<1x128xf32>
    %12 = arith.cmpf ogt, %10, %11 : vector<1x128xf32>
    %c0_10 = arith.constant 0 : index
    %c0_11 = arith.constant 0 : index
    %13 = vector.load %arg1[%c0_10, %c0_11] : memref<8x32xf32, #tpu.memory_space<vmem>>, vector<8x32xf32>
    %c0_12 = arith.constant 0 : index
    %c0_13 = arith.constant 0 : index
    %14 = vector.load %arg2[%c0_12, %c0_13] : memref<32x128xbf16, #tpu.memory_space<vmem>>, vector<32x128xbf16>
    %15 = arith.truncf %13 : vector<8x32xf32> to vector<8x32xbf16>
    %cst_14 = arith.constant dense<0.000000e+00> : vector<8x128xf32>
    %16 = tpu.matmul %15, %14, %cst_14 {dimension_numbers = #tpu.dot_dimension_numbers<[1], [0], [0], [1], [0, 0, 1, 1], [], []>} : vector<8x32xbf16>, vector<32x128xbf16>, vector<8x128xf32> -> vector<8x128xf32>
    %17 = vector.broadcast %0 : vector<1x128xf32> to vector<8x128xf32>
    %18 = arith.addf %16, %17 : vector<8x128xf32>
    %cst_15 = arith.constant dense<0.000000e+00> : vector<8xf32>
    %19 = vector.multi_reduction <add>, %18, %cst_15 [1] : vector<8x128xf32> to vector<8xf32>
    %20 = vector.shape_cast %19 : vector<8xf32> to vector<8x1xf32>
    %21 = arith.mulf %18, %18 : vector<8x128xf32>
    %cst_16 = arith.constant dense<0.000000e+00> : vector<8xf32>
    %22 = vector.multi_reduction <add>, %21, %cst_16 [1] : vector<8x128xf32> to vector<8xf32>
    %23 = vector.shape_cast %22 : vector<8xf32> to vector<8x1xf32>
    %cst_17 = arith.constant 1.562500e-02 : f32
    %24 = vector.broadcast %cst_17 : f32 to vector<8x1xf32>
    %25 = arith.mulf %20, %24 : vector<8x1xf32>
    %cst_18 = arith.constant 1.562500e-02 : f32
    %26 = vector.broadcast %cst_18 : f32 to vector<8x1xf32>
    %27 = arith.mulf %23, %26 : vector<8x1xf32>
    %28 = arith.mulf %25, %25 : vector<8x1xf32>
    %29 = arith.subf %27, %28 : vector<8x1xf32>
    %cst_19 = arith.constant 0.000000e+00 : f32
    %30 = vector.broadcast %cst_19 : f32 to vector<8x1xf32>
    %31 = arith.maximumf %29, %30 : vector<8x1xf32>
    %32 = vector.broadcast %25 : vector<8x1xf32> to vector<8x128xf32>
    %33 = arith.subf %18, %32 : vector<8x128xf32>
    %cst_20 = arith.constant 9.99999974E-6 : f32
    %34 = vector.broadcast %cst_20 : f32 to vector<8x1xf32>
    %35 = arith.addf %31, %34 : vector<8x1xf32>
    %36 = math.rsqrt %35 : vector<8x1xf32>
    %37 = vector.broadcast %36 : vector<8x1xf32> to vector<8x128xf32>
    %38 = arith.mulf %33, %37 : vector<8x128xf32>
    %39 = vector.broadcast %1 : vector<1x128xf32> to vector<8x128xf32>
    %40 = arith.mulf %38, %39 : vector<8x128xf32>
    %41 = vector.broadcast %2 : vector<1x128xf32> to vector<8x128xf32>
    %42 = arith.addf %40, %41 : vector<8x128xf32>
    %cst_21 = arith.constant 5.000000e-01 : f32
    %43 = vector.broadcast %cst_21 : f32 to vector<8x128xf32>
    %44 = arith.mulf %43, %42 : vector<8x128xf32>
    %cst_22 = arith.constant 0.707106769 : f32
    %45 = vector.broadcast %cst_22 : f32 to vector<8x128xf32>
    %46 = arith.mulf %42, %45 : vector<8x128xf32>
    %47 = math.erf %46 : vector<8x128xf32>
    %cst_23 = arith.constant 1.000000e+00 : f32
    %48 = vector.broadcast %cst_23 : f32 to vector<8x128xf32>
    %49 = arith.addf %48, %47 : vector<8x128xf32>
    %50 = arith.mulf %44, %49 : vector<8x128xf32>
    %c0_24 = arith.constant 0 : index
    %c0_25 = arith.constant 0 : index
    %51 = vector.load %arg3[%c0_24, %c0_25] : memref<128x128xbf16, #tpu.memory_space<vmem>>, vector<128x128xbf16>
    %52 = arith.truncf %50 : vector<8x128xf32> to vector<8x128xbf16>
    %cst_26 = arith.constant dense<0.000000e+00> : vector<8x128xf32>
    %53 = tpu.matmul %52, %51, %cst_26 {dimension_numbers = #tpu.dot_dimension_numbers<[1], [0], [0], [1], [0, 0, 1, 1], [], []>} : vector<8x128xbf16>, vector<128x128xbf16>, vector<8x128xf32> -> vector<8x128xf32>
    %54 = vector.broadcast %3 : vector<1x128xf32> to vector<8x128xf32>
    %55 = arith.addf %53, %54 : vector<8x128xf32>
    %cst_27 = arith.constant dense<0.000000e+00> : vector<8xf32>
    %56 = vector.multi_reduction <add>, %55, %cst_27 [1] : vector<8x128xf32> to vector<8xf32>
    %57 = vector.shape_cast %56 : vector<8xf32> to vector<8x1xf32>
    %58 = arith.mulf %55, %55 : vector<8x128xf32>
    %cst_28 = arith.constant dense<0.000000e+00> : vector<8xf32>
    %59 = vector.multi_reduction <add>, %58, %cst_28 [1] : vector<8x128xf32> to vector<8xf32>
    %60 = vector.shape_cast %59 : vector<8xf32> to vector<8x1xf32>
    %cst_29 = arith.constant 1.562500e-02 : f32
    %61 = vector.broadcast %cst_29 : f32 to vector<8x1xf32>
    %62 = arith.mulf %57, %61 : vector<8x1xf32>
    %cst_30 = arith.constant 1.562500e-02 : f32
    %63 = vector.broadcast %cst_30 : f32 to vector<8x1xf32>
    %64 = arith.mulf %60, %63 : vector<8x1xf32>
    %65 = arith.mulf %62, %62 : vector<8x1xf32>
    %66 = arith.subf %64, %65 : vector<8x1xf32>
    %cst_31 = arith.constant 0.000000e+00 : f32
    %67 = vector.broadcast %cst_31 : f32 to vector<8x1xf32>
    %68 = arith.maximumf %66, %67 : vector<8x1xf32>
    %69 = vector.broadcast %62 : vector<8x1xf32> to vector<8x128xf32>
    %70 = arith.subf %55, %69 : vector<8x128xf32>
    %cst_32 = arith.constant 9.99999974E-6 : f32
    %71 = vector.broadcast %cst_32 : f32 to vector<8x1xf32>
    %72 = arith.addf %68, %71 : vector<8x1xf32>
    %73 = math.rsqrt %72 : vector<8x1xf32>
    %74 = vector.broadcast %73 : vector<8x1xf32> to vector<8x128xf32>
    %75 = arith.mulf %70, %74 : vector<8x128xf32>
    %76 = vector.broadcast %4 : vector<1x128xf32> to vector<8x128xf32>
    %77 = arith.mulf %75, %76 : vector<8x128xf32>
    %78 = vector.broadcast %5 : vector<1x128xf32> to vector<8x128xf32>
    %79 = arith.addf %77, %78 : vector<8x128xf32>
    %cst_33 = arith.constant 5.000000e-01 : f32
    %80 = vector.broadcast %cst_33 : f32 to vector<8x128xf32>
    %81 = arith.mulf %80, %79 : vector<8x128xf32>
    %cst_34 = arith.constant 0.707106769 : f32
    %82 = vector.broadcast %cst_34 : f32 to vector<8x128xf32>
    %83 = arith.mulf %79, %82 : vector<8x128xf32>
    %84 = math.erf %83 : vector<8x128xf32>
    %cst_35 = arith.constant 1.000000e+00 : f32
    %85 = vector.broadcast %cst_35 : f32 to vector<8x128xf32>
    %86 = arith.addf %85, %84 : vector<8x128xf32>
    %87 = arith.mulf %81, %86 : vector<8x128xf32>
    %c0_36 = arith.constant 0 : index
    %c0_37 = arith.constant 0 : index
    %88 = vector.load %arg4[%c0_36, %c0_37] : memref<128x128xbf16, #tpu.memory_space<vmem>>, vector<128x128xbf16>
    %89 = arith.truncf %87 : vector<8x128xf32> to vector<8x128xbf16>
    %cst_38 = arith.constant dense<0.000000e+00> : vector<8x128xf32>
    %90 = tpu.matmul %89, %88, %cst_38 {dimension_numbers = #tpu.dot_dimension_numbers<[1], [0], [0], [1], [0, 0, 1, 1], [], []>} : vector<8x128xbf16>, vector<128x128xbf16>, vector<8x128xf32> -> vector<8x128xf32>
    %91 = vector.broadcast %6 : vector<1x128xf32> to vector<8x128xf32>
    %92 = arith.addf %90, %91 : vector<8x128xf32>
    %cst_39 = arith.constant 0.000000e+00 : f32
    %93 = vector.broadcast %cst_39 : f32 to vector<8x128xf32>
    %94 = arith.subf %93, %92 : vector<8x128xf32>
    %95 = vector.shape_cast %12 : vector<1x128xi1> to vector<1x128xi1>
    %96 = vector.broadcast %95 : vector<1x128xi1> to vector<8x128xi1>
    %97 = arith.select %96, %94, %92 : vector<8x128xi1>, vector<8x128xf32>
    %98 = math.exp %97 : vector<8x128xf32>
    %cst_40 = arith.constant 1.000000e+00 : f32
    %99 = vector.broadcast %cst_40 : f32 to vector<8x128xf32>
    %100 = arith.addf %99, %98 : vector<8x128xf32>
    %101 = tpu.reciprocal %100 {approx = true} : vector<8x128xf32> -> vector<8x128xf32>
    %102 = vector.shape_cast %9 : vector<1x128xi1> to vector<1x128xi1>
    %103 = vector.broadcast %102 : vector<1x128xi1> to vector<8x128xi1>
    %104 = arith.select %103, %98, %92 : vector<8x128xi1>, vector<8x128xf32>
    %105 = vector.shape_cast %12 : vector<1x128xi1> to vector<1x128xi1>
    %106 = vector.broadcast %105 : vector<1x128xi1> to vector<8x128xi1>
    %107 = arith.select %106, %101, %104 : vector<8x128xi1>, vector<8x128xf32>
    %c0_41 = arith.constant 0 : index
    %c0_42 = arith.constant 0 : index
    %108 = vector.load %arg6[%c0_41, %c0_42] : memref<8x128xf32, #tpu.memory_space<vmem>>, vector<8x128xf32>
    tpu.vector_store %arg6[%c0_41, %c0_42], %107 {strides = array<i32>} : memref<8x128xf32, #tpu.memory_space<vmem>>, vector<8x128xf32>,
    return
  }
  func.func @transform_0(%arg0: i32) -> (i32, i32) {
    %c0_i32 = arith.constant 0 : i32
    %c0_i32_0 = arith.constant 0 : i32
    return %arg0, %c0_i32 : i32, i32
  }
  func.func @transform_1(%arg0: i32) -> (i32, i32) {
    %c0_i32 = arith.constant 0 : i32
    %c0_i32_0 = arith.constant 0 : i32
    %c0_i32_1 = arith.constant 0 : i32
    return %c0_i32, %c0_i32_0 : i32, i32
  }
  func.func @transform_2(%arg0: i32) -> (i32, i32) {
    %c0_i32 = arith.constant 0 : i32
    %c0_i32_0 = arith.constant 0 : i32
    %c0_i32_1 = arith.constant 0 : i32
    return %c0_i32, %c0_i32_0 : i32, i32
  }
  func.func @transform_3(%arg0: i32) -> (i32, i32) {
    %c0_i32 = arith.constant 0 : i32
    %c0_i32_0 = arith.constant 0 : i32
    %c0_i32_1 = arith.constant 0 : i32
    return %c0_i32, %c0_i32_0 : i32, i32
  }
  func.func @transform_4(%arg0: i32) -> (i32, i32) {
    %c0_i32 = arith.constant 0 : i32
    %c0_i32_0 = arith.constant 0 : i32
    %c0_i32_1 = arith.constant 0 : i32
    return %c0_i32, %c0_i32_0 : i32, i32
  }
  func.func @transform_5(%arg0: i32) -> (i32, i32) {
    %c0_i32 = arith.constant 0 : i32
    %c0_i32_0 = arith.constant 0 : i32
    return %arg0, %c0_i32 : i32, i32
  }
}

</mosaic_0001>

<bundles_post_ra>
// kernel: tpu_custom_call.1
= control target key start
LH: loop header
LB: loop body
LE: loop exit
PB: predicated region body
PF: predicated region fallthrough
CT: control target
= control target key end

     0   :  { %10 = vsyncpa [#allocation3], 0  ;;  %s838_s0 = inlined_call_operand.hbm [shape: f32[8,32], index: 0, kind: input, shape index: {}]   ;;  %s839_s1 = inlined_call_operand.hbm [shape: bf16[32,128], index: 1, kind: input, shape index: {}]   ;;  %s840_s2 = inlined_call_operand.hbm [shape: bf16[128,128], index: 2, kind: input, shape index: {}]   ;;  %s841_s3 = inlined_call_operand.hbm [shape: bf16[128,128], index: 3, kind: input, shape index: {}]   ;;  %s842_s4 = inlined_call_operand.hbm [shape: f32[9,128], index: 4, kind: input, shape index: {}]   ;;  %s843_s5 = inlined_call_operand.hbm [shape: f32[8,128], index: 5, kind: output, shape index: {}]  }
   0x1   :  { %11 = vsyncpa [#allocation6], 0 }
   0x2   :  { %12 = vsyncpa [#allocation9], 0 }
   0x3   :  { %13 = vsyncpa [#allocation4], 0  ;;  %s745_s18 = smov [#allocation5]  }
   0x4   :  { %s29_s19 = sshll.u32 %s745_s18, 4  ;;  %s30_s19 = int_to_ptr.vmem [resolvable:$true] %s29_s19 }
   0x5   :  { %s625_s20 = scalar_lea.vmem %s30_s19, 256  ;;  %p630_p1 = scmp.lt.s32.totalorder %s30_s19, %s30_s19 }
   0x6   :  { %p626_p0 = scmp.ne.s32.totalorder %s30_s19, %s625_s20  ;;  %p631_p2 = scmp.lt.s32.totalorder %s625_s20, %s625_s20 }
   0x8   :  { %p632_p3 = por %p631_p2, %p630_p1 }
   0xa   :  { %p633_p4 = pnand %p632_p3, %p626_p0 }
   0xc   :  { %636 = shalt.err (!%p633_p4)
}
   0xd   :  { %s746_s21 = smov 64   ;;  %s747_s22 = smov 4  }
   0xe   :  { %35 = dma.hbm_to_vmem [thread:$0]  %s839_s1, 256, %s30_s19, [#allocation6], %s746_s21, %s746_s21, %s747_s22  }
   0xf   :  { %s748_s25 = smov [#allocation8]   ;;  %s749_s27 = smov [#allocation2]  }
  0x10   :  { %s53_s26 = sshll.u32 %s748_s25, 4  ;;  %s20_s28 = sshll.u32 %s749_s27, 4  ;;  %s54_s26 = int_to_ptr.vmem [resolvable:$true] %s53_s26  ;;  %s21_s28 = int_to_ptr.vmem [resolvable:$true] %s20_s28 }
  0x11   :  { %s645_s29 = scalar_lea.vmem %s54_s26, 1024  ;;  %p650_p6 = scmp.lt.s32.totalorder %s54_s26, %s54_s26 }
  0x12   :  { %p646_p5 = scmp.ne.s32.totalorder %s54_s26, %s645_s29  ;;  %p651_p7 = scmp.lt.s32.totalorder %s645_s29, %s645_s29 }
  0x14   :  { %p652_p8 = por %p651_p7, %p650_p6 }
  0x16   :  { %p653_p9 = pnand %p652_p8, %p646_p5 }
  0x18   :  { %656 = shalt.err (!%p653_p9)
}
  0x19   :  { %59 = dma.hbm_to_vmem [thread:$0]  %s841_s3, 1024, %s54_s26, [#allocation9], %s746_s21, %s746_s21, %s747_s22  }
  0x1a   :  { %s665_s1 = scalar_lea.vmem %s21_s28, 128  ;;  %p670_p11 = scmp.lt.s32.totalorder %s21_s28, %s21_s28 }
  0x1b   :  { %p666_p10 = scmp.ne.s32.totalorder %s21_s28, %s665_s1  ;;  %p671_p12 = scmp.lt.s32.totalorder %s665_s1, %s665_s1 }
  0x1d   :  { %p672_p13 = por %p671_p12, %p670_p11 }
  0x1f   :  { %p673_p0 = pnand %p672_p13, %p666_p10 }
  0x21   :  { %676 = shalt.err (!%p673_p0)
}
  0x22   :  { %23 = dma.hbm_to_vmem [thread:$0]  %s838_s0, 128, %s21_s28, [#allocation3]  }
  0x23   :  { %s750_s9 = smov [#allocation7]   ;;  %s751_s11 = smov [#allocation10]  }
  0x24   :  { %s41_s10 = sshll.u32 %s750_s9, 4  ;;  %s65_s12 = sshll.u32 %s751_s11, 4  ;;  %s42_s10 = int_to_ptr.vmem [resolvable:$true] %s41_s10  ;;  %s66_s12 = int_to_ptr.vmem [resolvable:$true] %s65_s12 }
  0x25   :  { %s685_s13 = scalar_lea.vmem %s42_s10, 1024  ;;  %p690_p2 = scmp.lt.s32.totalorder %s42_s10, %s42_s10 }
  0x26   :  { %p686_p1 = scmp.ne.s32.totalorder %s42_s10, %s685_s13  ;;  %p691_p3 = scmp.lt.s32.totalorder %s685_s13, %s685_s13 }
  0x28   :  { %p692_p4 = por %p691_p3, %p690_p2 }
  0x2a   :  { %p693_p5 = pnand %p692_p4, %p686_p1 }
  0x2c   :  { %696 = shalt.err (!%p693_p5)
}
  0x2d   :  { %47 = dma.hbm_to_vmem [thread:$0]  %s840_s2, 1024, %s42_s10, [#allocation6], %s746_s21, %s746_s21, %s747_s22  }
  0x2e   :  { %s705_s0 = scalar_lea.vmem %s66_s12, 256  ;;  %p710_p7 = scmp.lt.s32.totalorder %s66_s12, %s66_s12 }
  0x2f   :  { %p706_p6 = scmp.ne.s32.totalorder %s66_s12, %s705_s0  ;;  %p711_p8 = scmp.lt.s32.totalorder %s705_s0, %s705_s0 }
  0x31   :  { %p712_p9 = por %p711_p8, %p710_p7 }
  0x33   :  { %p713_p10 = pnand %p712_p9, %p706_p6 }
  0x35   :  { %716 = shalt.err (!%p713_p10)
}
  0x36   :  { %s752_s15 = smov 128   ;;  %s753_s16 = smov 8  }
  0x37   :  { %71 = dma.hbm_to_vmem [thread:$0]  %s842_s4, 256, %s66_s12, [#allocation9], %s752_s15, %s752_s15, %s753_s16  }
  0x38   :  { %737 = dma.done.wait [#allocation3], 128  }
  0x39   :  { %738 = vsyncadd [#allocation3], 4294967168 }
  0x3a   :  { %739 = dma.done.wait [#allocation6], 1280  }
  0x3b   :  { %740 = vsyncadd [#allocation6], 4294966016 }
  0x3c   :  { %741 = dma.done.wait [#allocation9], 1280  }
  0x3d   :  { %742 = vsyncadd [#allocation9], 4294966016  ;;  %v754_v0 = vmov 0.0   ;;  %vm755_vm0 = vmmov 0   ;;  %v587_v1 = vld [vmem:[#allocation5 + $0x8] sm:$0xff]   ;;  %v588_v2 = vld [vmem:[#allocation5] sm:$0xff]  }
  0x3e   :  { %526 = vmatprep.subr.bf16.mxu0 %v754_v0  ;;  %530 = vmatprep.mubr.msk.bf16.mxu0 %vm755_vm0, %v754_v0  ;;  %v99_v3 = vld [vmem:[#allocation2] sm:$0xff]  ;;  %vm121_vm1 = vcmask 261120   ;;  %v479_v5 = vld [vmem:[#allocation10] ss:$0 sm:$0xff]  ;;  %v589_v12 = vld [vmem:[#allocation7 + $0x38] sm:$0xff]   ;;  %s757_s2 = smov [#allocation11]  }
  0x3f   :  { %534 = vmatprep.subr.bf16.mxu1 %v754_v0  ;;  %550 = vmatprep.mubr.msk.bf16.mxu1 %vm755_vm0, %v754_v0  ;;  %v104_v4 = vpack.c.bf16 %v99_v3, %v99_v3  ;;  %v590_v13 = vld [vmem:[#allocation7 + $0x30] sm:$0xff]   ;;  %v591_v14 = vld [vmem:[#allocation7 + $0x28] sm:$0xff]   ;;  %v592_v15 = vld [vmem:[#allocation7 + $0x20] sm:$0xff]   ;;  %s468_s4 = sshll.u32 %s757_s2, 4  ;;  %s469_s4 = int_to_ptr.vmem [resolvable:$true] %s468_s4 }
  0x40   :  { %527 = vmatpush3.bf16.msra.mxu0 %v587_v1  ;;  %535 = vmatpush3.bf16.msra.mxu1 %v589_v12  ;;  %v593_v16 = vld [vmem:[#allocation7 + $0x18] sm:$0xff]   ;;  %v594_v17 = vld [vmem:[#allocation7 + $0x10] sm:$0xff]   ;;  %v595_v18 = vld [vmem:[#allocation7 + $0x8] sm:$0xff]   ;;  %s717_s19 = scalar_lea.vmem %s469_s4, 128  ;;  %p722_p12 = scmp.lt.s32.totalorder %s469_s4, %s469_s4 }
  0x41   :  { %528 = vmatprep.subr.bf16.mxu0 %v754_v0  ;;  %536 = vmatprep.subr.bf16.mxu1 %v754_v0  ;;  %v596_v19 = vld [vmem:[#allocation7] sm:$0xff]   ;;  %v597_v48 = vld [vmem:[#allocation8 + $0x38] sm:$0xff]   ;;  %v598_v49 = vld [vmem:[#allocation8 + $0x30] sm:$0xff]   ;;  %p718_p11 = scmp.ne.s32.totalorder %s469_s4, %s717_s19  ;;  %p723_p13 = scmp.lt.s32.totalorder %s717_s19, %s717_s19 }
  0x42   :  { %v483_v30 = vld [vmem:[#allocation10 + $0x1] ss:$0 sm:$0xff]  ;;  %v484_v32 = vld [vmem:[#allocation10 + $0x2] ss:$0 sm:$0xff]  ;;  %v485_v41 = vld [vmem:[#allocation10 + $0x3] ss:$0 sm:$0xff] }
  0x43   :  { %v599_v50 = vld [vmem:[#allocation8 + $0x28] sm:$0xff]   ;;  %v600_v51 = vld [vmem:[#allocation8 + $0x20] sm:$0xff]   ;;  %v601_v52 = vld [vmem:[#allocation8 + $0x18] sm:$0xff]   ;;  %p724_p0 = por %p723_p13, %p722_p12 }
  0x44   :  { %529 = vmatpush3.bf16.msra.mxu0 %v588_v2  ;;  %537 = vmatpush3.bf16.msra.mxu1 %v590_v13  ;;  %v602_v53 = vld [vmem:[#allocation8 + $0x10] sm:$0xff]   ;;  %v603_v54 = vld [vmem:[#allocation8 + $0x8] sm:$0xff]   ;;  %v604_v55 = vld [vmem:[#allocation8] sm:$0xff]   ;;  %v443_v13 = vlaneseq }
  0x45   :  { %554 = vmatprep.subr.bf16.mxu0 %v754_v0  ;;  %538 = vmatprep.subr.bf16.mxu1 %v754_v0  ;;  %v494_v3 = vld [vmem:[#allocation10 + $0x4] ss:$0 sm:$0xff]  ;;  %p725_p1 = pnand %p724_p0, %p718_p11 }
  0x47   :  { %531 = vmatmul.mubr.msk.bf16.vlgmr.msra.gmra.mxu0 %vm121_vm1, %v104_v4 }
  0x48   :  { %570 = vmatprep.mubr.msk.bf16.mxu0 %vm755_vm0, %v754_v0  ;;  %539 = vmatpush3.bf16.msra.mxu1 %v591_v14  ;;  %v97_v14 = vld [vmem:[#allocation10 + $0x8] sm:$0x1] }
  0x49   :  { %540 = vmatprep.subr.bf16.mxu1 %v754_v0  ;;  %555 = vmatpush3.bf16.msra.mxu0 %v597_v48  ;;  %vm98_vm2 = vcmp.gt.f32.partialorder %v97_v14, 0.5 }
  0x4a   :  { %556 = vmatprep.subr.bf16.mxu0 %v754_v0 }
  0x4c   :  { %541 = vmatpush3.bf16.msra.mxu1 %v592_v15  ;;  %v444_v15 = vshrl.u32 %v443_v13, 7 }
  0x4d   :  { %542 = vmatprep.subr.bf16.mxu1 %v754_v0  ;;  %557 = vmatpush3.bf16.msra.mxu0 %v598_v49 }
  0x4e   :  { %558 = vmatprep.subr.bf16.mxu0 %v754_v0 }
  0x50   :  { %543 = vmatpush3.bf16.msra.mxu1 %v593_v16  ;;  %v445_v16 = vsub.s32 0, %v444_v15 }
  0x51   :  { %544 = vmatprep.subr.bf16.mxu1 %v754_v0  ;;  %559 = vmatpush3.bf16.msra.mxu0 %v599_v50 }
  0x52   :  { %560 = vmatprep.subr.bf16.mxu0 %v754_v0 }
  0x54   :  { %545 = vmatpush3.bf16.msra.mxu1 %v594_v17  ;;  %v756_v17 = vmov 0  }
  0x55   :  { %546 = vmatprep.subr.bf16.mxu1 %v754_v0  ;;  %561 = vmatpush3.bf16.msra.mxu0 %v600_v51 }
  0x56   :  { %562 = vmatprep.subr.bf16.mxu0 %v754_v0 }
  0x58   :  { %547 = vmatpush3.bf16.msra.mxu1 %v595_v18  ;;  %v442_v18 = vsel %vm98_vm2, 1, %v756_v17 }
  0x59   :  { %548 = vmatprep.subr.bf16.mxu1 %v754_v0  ;;  %563 = vmatpush3.bf16.msra.mxu0 %v601_v52 }
  0x5a   :  { %564 = vmatprep.subr.bf16.mxu0 %v754_v0 }
  0x5c   :  { %549 = vmatpush3.bf16.msra.mxu1 %v596_v19  ;;  %v496_v19 = vld [vmem:[#allocation10 + $0x6] ss:$0 sm:$0xff] }
  0x5d   :  { %565 = vmatpush3.bf16.msra.mxu0 %v602_v53 }
  0x5e   :  { %566 = vmatprep.subr.bf16.mxu0 %v754_v0 }
  0x61   :  { %567 = vmatpush3.bf16.msra.mxu0 %v603_v54 }
  0x62   :  { %568 = vmatprep.subr.bf16.mxu0 %v754_v0 }
  0x65   :  { %569 = vmatpush3.bf16.msra.mxu0 %v604_v55 }
 0x107   :  { %v159_v6 = vpop.f32.mrf.mxu0 }
 0x108   :  { %v160_v7 = vadd.f32 %v479_v5, %v159_v6  ;;  %v495_v5 = vld [vmem:[#allocation10 + $0x5] ss:$0 sm:$0xff] }
 0x109   :  { %v532_v8 = vpop.f32.mrf.mxu0 }
 0x10a   :  { %165 = vadd.xlane.f32.xlu0 %v160_v7  ;;  %v167_v10 = vmul.f32 %v160_v7, %v160_v7 }
 0x10b   :  { %v162_v9 = vpop.f32.mrf.mxu0 }
 0x10d   :  { %v533_v11 = vpop.f32.mrf.mxu0 }
 0x10e   :  { %168 = vadd.xlane.f32.xlu0 %v167_v10 }
 0x193   :  { %v166_v20 = vpop.xlane.xlu0 %165 }
 0x194   :  { %v170_v21 = vmul.f32 0.015625, %v166_v20  ;;  %v446_v20 = vrot.slane %v442_v18, %v445_v16 }
 0x196   :  { %v172_v23 = vmul.f32 %v170_v21, %v170_v21  ;;  %v175_v28 = vsub.f32 %v160_v7, %v170_v21  ;;  %vm447_vm3 = vcmp.eq.s32.totalorder %v446_v20, 1 }
 0x197   :  { %v169_v22 = vpop.xlane.xlu0 %168 }
 0x198   :  { %v171_v24 = vmul.f32 0.015625, %v169_v22 }
 0x19a   :  { %v173_v25 = vsub.f32 %v171_v24, %v172_v23 }
 0x19c   :  { %v174_v26 = vmax.f32 %v173_v25, 0.0 }
 0x19e   :  { %v176_v27 = vadd.f32 1e-05, %v174_v26 }
 0x1a0   :  { %605 = vrsqrt.f32 %v176_v27 }
 0x1ad   :  { %v606_v29 = vpop.eup %605 }
 0x1ae   :  { %v178_v31 = vmul.f32 %v606_v29, %v175_v28 }
 0x1b0   :  { %v183_v33 = vmul.f32 %v483_v30, %v178_v31  ;;  %v95_v30 = vld [vmem:[#allocation10 + $0x7] sm:$0x1] }
 0x1b1   :  { %vm96_vm4 = vcmp.gt.f32.partialorder %v95_v30, 0.5 }
 0x1b2   :  { %v188_v34 = vadd.f32 %v484_v32, %v183_v33  ;;  %v453_v32 = vsel %vm96_vm4, 1, %v756_v17 }
 0x1b3   :  { %v457_v33 = vrot.slane %v453_v32, %v445_v16 }
 0x1b4   :  { %v190_v35 = vmul.f32 0.70710677, %v188_v34  ;;  %v189_v37 = vmul.f32 0.5, %v188_v34 }
 0x1b5   :  { %vm458_vm5 = vcmp.eq.s32.totalorder %v457_v33, 1 }
 0x1b6   :  { %607 = verf.f32 %v190_v35 }
 0x1c3   :  { %v608_v36 = vpop.eup %607 }
 0x1c4   :  { %v192_v38 = vadd.f32 1.0, %v608_v36 }
 0x1c6   :  { %v193_v39 = vmul.f32 %v192_v38, %v189_v37 }
 0x1c8   :  { %v210_v40 = vpack.c.bf16 %v193_v39, %v193_v39 }
 0x1ca   :  { %551 = vmatmul.mubr.bf16.vlgmr.msra.gmra.mxu1 %v210_v40 }
 0x28a   :  { %v297_v42 = vpop.f32.mrf.mxu1 }
 0x28b   :  { %v298_v43 = vadd.f32 %v485_v41, %v297_v42 }
 0x28c   :  { %v552_v44 = vpop.f32.mrf.mxu1 }
 0x28d   :  { %303 = vadd.xlane.f32.xlu1 %v298_v43  ;;  %v305_v46 = vmul.f32 %v298_v43, %v298_v43 }
 0x28e   :  { %v300_v45 = vpop.f32.mrf.mxu1 }
 0x290   :  { %v553_v47 = vpop.f32.mrf.mxu1 }
 0x291   :  { %306 = vadd.xlane.f32.xlu1 %v305_v46 }
 0x316   :  { %v304_v56 = vpop.xlane.xlu1 %303 }
 0x317   :  { %v308_v57 = vmul.f32 0.015625, %v304_v56 }
 0x319   :  { %v310_v59 = vmul.f32 %v308_v57, %v308_v57  ;;  %v313_v1 = vsub.f32 %v298_v43, %v308_v57 }
 0x31a   :  { %v307_v58 = vpop.xlane.xlu1 %306 }
 0x31b   :  { %v309_v60 = vmul.f32 0.015625, %v307_v58 }
 0x31d   :  { %v311_v61 = vsub.f32 %v309_v60, %v310_v59 }
 0x31f   :  { %v312_v62 = vmax.f32 %v311_v61, 0.0 }
 0x321   :  { %v314_v63 = vadd.f32 1e-05, %v312_v62 }
 0x323   :  { %609 = vrsqrt.f32 %v314_v63 }
 0x330   :  { %v610_v2 = vpop.eup %609 }
 0x331   :  { %v316_v4 = vmul.f32 %v610_v2, %v313_v1 }
 0x333   :  { %v321_v6 = vmul.f32 %v494_v3, %v316_v4 }
 0x335   :  { %v326_v7 = vadd.f32 %v495_v5, %v321_v6 }
 0x337   :  { %v328_v8 = vmul.f32 0.70710677, %v326_v7  ;;  %v327_v9 = vmul.f32 0.5, %v326_v7 }
 0x339   :  { %611 = verf.f32 %v328_v8 }
 0x346   :  { %v612_v0 = vpop.eup %611 }
 0x347   :  { %v330_v10 = vadd.f32 1.0, %v612_v0 }
 0x349   :  { %v331_v11 = vmul.f32 %v330_v10, %v327_v9 }
 0x34b   :  { %v348_v12 = vpack.c.bf16 %v331_v11, %v331_v11 }
 0x34d   :  { %571 = vmatmul.mubr.bf16.vlgmr.msra.gmra.mxu0 %v348_v12 }
 0x40d   :  { %v435_v21 = vpop.f32.mrf.mxu0 }
 0x40e   :  { %v436_v22 = vadd.f32 %v496_v19, %v435_v21 }
 0x40f   :  { %v572_v23 = vpop.f32.mrf.mxu0 }
 0x410   :  { %v441_v24 = vsub.f32 0.0, %v436_v22 }
 0x411   :  { %v438_v25 = vpop.f32.mrf.mxu0 }
 0x412   :  { %v448_v26 = vsel %vm447_vm3, %v441_v24, %v436_v22 }
 0x413   :  { %v449_v27 = vmul.f32 1.442695, %v448_v26  ;;  %v573_v28 = vpop.f32.mrf.mxu0 }
 0x415   :  { %613 = vpow2.f32 %v449_v27 }
 0x422   :  { %v614_v29 = vpop.eup %613 }
 0x423   :  { %v451_v31 = vadd.f32 1.0, %v614_v29  ;;  %v459_v35 = vsel %vm458_vm5, %v614_v29, %v436_v22 }
 0x425   :  { %615 = vrcp.f32 %v451_v31 }
 0x432   :  { %v616_v34 = vpop.eup %615 }
 0x433   :  { %v460_v36 = vsel %vm447_vm3, %v616_v34, %v459_v35 }
 0x434   :  { %461 = vst [vmem:[#allocation11] sm:$0xff] %v460_v36 }
 0x435   :  { %728 = shalt.err (!%p725_p1)
}
 0x436   :  { %471 = dma.vmem_to_hbm [thread:$0]  %s469_s4, 128, %s843_s5, [#allocation4]  }
 0x437   :  { %743 = dma.done.wait [#allocation4], 128  }
 0x438   :  { %744 = vsyncadd [#allocation4], 4294967168 }
 0x439   :  { %475 = vsyncpa [#allocation3], 1 }
 0x43a   :  { %476 = vsyncpa [#allocation6], 1 }
 0x43b   :  { %477 = vsyncpa [#allocation9], 1 }
 0x43c   :  { %478 = vsyncpa [#allocation4], 1 }

</bundles_post_ra>
